<compile_context>
chip_gen: v7x
topology: tpu7x:2x2x1
jax: 0.10.0
libtpu: 0.0.40
codegen_flags: <defaults>
</compile_context>

<pallas_src>
import functools
import math

import jax
import jax.numpy as jnp
from jax.experimental import pallas as pl
from jax.experimental.pallas import tpu as pltpu

# ---------------- small BERT config (synthetic, deterministic init) ----------------
VOCAB = 100
TYPE_VOCAB = 2
MAX_POS = 16
HIDDEN = 32
N_LAYERS = 2
N_HEADS = 2
HEAD_DIM = HIDDEN // N_HEADS
INTERMEDIATE = 64
LN_EPS = 1e-12

_VMEM = pl.BlockSpec(memory_space=pltpu.MemorySpace.VMEM)  # whole-array block in VMEM


# ------------------------- value-level helpers (used in kernels) -------------------------
def _layernorm(h, g, b):
    mu = jnp.mean(h, axis=-1, keepdims=True)
    var = jnp.mean((h - mu) * (h - mu), axis=-1, keepdims=True)
    return (h - mu) * jax.lax.rsqrt(var + LN_EPS) * g + b


def _gelu(h):
    # TODO(synk): HF BERT default is exact erf-GELU; tanh approximation used here.
    c = math.sqrt(2.0 / math.pi)
    return 0.5 * h * (1.0 + jnp.tanh(c * (h + 0.044715 * h * h * h)))


def _bf16(x):
    return x.astype(jnp.bfloat16)


# ---------------------------------- Pallas kernels ----------------------------------
def _emb_ln_kernel(x_ref, g_ref, b_ref, o_ref):
    o_ref[...] = _layernorm(x_ref[...], g_ref[...], b_ref[...])


def _layer_kernel(x_ref, mask_ref,
                  qkv_w_ref, qkv_b_ref,
                  ao_w_ref, ao_b_ref, ln1_g_ref, ln1_b_ref,
                  i_w_ref, i_b_ref, o_w_ref, o_b_ref,
                  ln2_g_ref, ln2_b_ref,
                  o_ref):
    """One full BERT encoder layer, fused. x: (B*S, HIDDEN) fp32."""
    x = x_ref[...]                                       # (BS, HIDDEN)
    bs = x.shape[0]

    # --- fused QKV projection: single lane-dense 3*HIDDEN matmul (bf16 in, f32 acc) ---
    qkv = jnp.dot(_bf16(x), _bf16(qkv_w_ref[...]),
                  preferred_element_type=jnp.float32) + qkv_b_ref[...]   # (BS, 3H)

    mask = mask_ref[...]                                 # (BS, BS) additive mask
    ao_w = ao_w_ref[...]                                 # (HIDDEN, HIDDEN)
    scale = 1.0 / math.sqrt(HEAD_DIM)

    # --- attention: batch folded into the M (sublane) dim; heads unrolled statically.
    #     The head-merge + output projection is accumulated per head (ctx @ W_o ==
    #     sum_h ctx_h @ W_o[h]), so no in-kernel concat / transpose is needed. ---
    attn = jnp.zeros((bs, HIDDEN), jnp.float32)
    for h in range(N_HEADS):
        q_h = qkv[:, h * HEAD_DIM:(h + 1) * HEAD_DIM]
        k_h = qkv[:, HIDDEN + h * HEAD_DIM:HIDDEN + (h + 1) * HEAD_DIM]
        v_h = qkv[:, 2 * HIDDEN + h * HEAD_DIM:2 * HIDDEN + (h + 1) * HEAD_DIM]

        # scores = q @ k^T  (contract last dims; block-diagonal mask kills cross-batch)
        s = jax.lax.dot_general(
            _bf16(q_h), _bf16(k_h),
            dimension_numbers=(((1,), (1,)), ((), ())),
            preferred_element_type=jnp.float32)          # (BS, BS)
        s = s * scale + mask
        s = s - jnp.max(s, axis=-1, keepdims=True)
        p = jnp.exp(s)
        p = p * pl.reciprocal(jnp.sum(p, axis=-1, keepdims=True), approx=True)

        ctx_h = jnp.dot(_bf16(p), _bf16(v_h),
                        preferred_element_type=jnp.float32)              # (BS, D)
        attn = attn + jnp.dot(
            _bf16(ctx_h), _bf16(ao_w[h * HEAD_DIM:(h + 1) * HEAD_DIM, :]),
            preferred_element_type=jnp.float32)
    attn = attn + ao_b_ref[...]

    # --- residual + LayerNorm 1 ---
    h1 = _layernorm(attn + x, ln1_g_ref[...], ln1_b_ref[...])

    # --- FFN: intermediate (GELU) + output projection ---
    inter = jnp.dot(_bf16(h1), _bf16(i_w_ref[...]),
                    preferred_element_type=jnp.float32) + i_b_ref[...]
    inter = _gelu(inter)
    ffn = jnp.dot(_bf16(inter), _bf16(o_w_ref[...]),
                  preferred_element_type=jnp.float32) + o_b_ref[...]

    # --- residual + LayerNorm 2 ---
    o_ref[...] = _layernorm(ffn + h1, ln2_g_ref[...], ln2_b_ref[...])


# ---------------------------------- kernel wrappers ----------------------------------
def embed_layernorm(x2d, gamma, beta):
    return pl.pallas_call(
        _emb_ln_kernel,
        out_shape=jax.ShapeDtypeStruct(x2d.shape, jnp.float32),
        in_specs=[_VMEM, _VMEM, _VMEM],
        out_specs=_VMEM,
    )(x2d, gamma.reshape(1, -1), beta.reshape(1, -1))


def encoder_layer(x2d, mask2d, lp):
    bs, hid = x2d.shape
    return pl.pallas_call(
        _layer_kernel,
        out_shape=jax.ShapeDtypeStruct((bs, hid), jnp.float32),
        in_specs=[_VMEM] * 14,
        out_specs=_VMEM,
    )(x2d, mask2d,
      lp["qkv_w"], lp["qkv_b"].reshape(1, -1),
      lp["ao_w"], lp["ao_b"].reshape(1, -1),
      lp["ln1_g"].reshape(1, -1), lp["ln1_b"].reshape(1, -1),
      lp["i_w"], lp["i_b"].reshape(1, -1),
      lp["o_w"], lp["o_b"].reshape(1, -1),
      lp["ln2_g"].reshape(1, -1), lp["ln2_b"].reshape(1, -1))


# ---------------------------------- parameter init ----------------------------------
def init_params(key):
    std = 0.02
    keys = iter(jax.random.split(key, 8 + 8 * N_LAYERS))

    def nrm(shape):
        return (std * jax.random.normal(next(keys), shape)).astype(jnp.float32)

    params = {
        "word_emb": nrm((VOCAB, HIDDEN)),
        "pos_emb": nrm((MAX_POS, HIDDEN)),
        "type_emb": nrm((TYPE_VOCAB, HIDDEN)),
        "emb_ln_g": jnp.ones((HIDDEN,), jnp.float32),
        "emb_ln_b": jnp.zeros((HIDDEN,), jnp.float32),
        "pool_w": nrm((HIDDEN, HIDDEN)),
        "pool_b": jnp.zeros((HIDDEN,), jnp.float32),
        "layers": [],
    }
    for _ in range(N_LAYERS):
        params["layers"].append(
            {
                # q/k/v weights pre-concatenated -> single lane-dense QKV matmul
                "qkv_w": nrm((HIDDEN, 3 * HIDDEN)),
                "qkv_b": jnp.zeros((3 * HIDDEN,), jnp.float32),
                "ao_w": nrm((HIDDEN, HIDDEN)), "ao_b": jnp.zeros((HIDDEN,), jnp.float32),
                "ln1_g": jnp.ones((HIDDEN,), jnp.float32),
                "ln1_b": jnp.zeros((HIDDEN,), jnp.float32),
                "i_w": nrm((HIDDEN, INTERMEDIATE)),
                "i_b": jnp.zeros((INTERMEDIATE,), jnp.float32),
                "o_w": nrm((INTERMEDIATE, HIDDEN)),
                "o_b": jnp.zeros((HIDDEN,), jnp.float32),
                "ln2_g": jnp.ones((HIDDEN,), jnp.float32),
                "ln2_b": jnp.zeros((HIDDEN,), jnp.float32),
            }
        )
    return params


# ---------------------------------- BERT forward ----------------------------------
@functools.partial(jax.jit, static_argnames=("output_hidden_states",))
def bert_forward(params, input_ids, token_type_ids, attention_mask,
                 output_hidden_states=False):
    B, S = input_ids.shape

    # embeddings (gathers are glue)
    word = jnp.take(params["word_emb"], input_ids, axis=0)
    pos = params["pos_emb"][:S][None, :, :]
    tok = jnp.take(params["type_emb"], token_type_ids, axis=0)
    emb = (word + pos + tok).reshape(B * S, HIDDEN)
    hidden2d = embed_layernorm(emb, params["emb_ln_g"], params["emb_ln_b"])

    # Combined additive mask for the batch-folded attention layout: (B*S, B*S).
    # Block-diagonal (-1e9 across batches) + HF-style -10000 key-padding mask.
    # Built once per forward; tiny (1 KiB) at these shapes.
    # TODO(synk): at production S, keep the mask as (B, S) and broadcast in-kernel
    #             over a tiled/batched attention grid instead.
    ext = (1.0 - attention_mask.astype(jnp.float32)) * -10000.0           # (B, S)
    key_mask = jnp.broadcast_to(ext.reshape(1, B * S), (B * S, B * S))
    batch_id = jnp.arange(B * S) // S
    same = batch_id[:, None] == batch_id[None, :]
    mask2d = jnp.where(same, key_mask, -1e9).astype(jnp.float32)

    all_hidden = [hidden2d.reshape(B, S, HIDDEN)]
    for lp in params["layers"]:
        hidden2d = encoder_layer(hidden2d, mask2d, lp)   # one fused kernel per layer
        all_hidden.append(hidden2d.reshape(B, S, HIDDEN))

    last_hidden = hidden2d.reshape(B, S, HIDDEN)
    # pooler: (B,32)x(32,32)+tanh — kernel launch would cost ~100x the compute, so XLA.
    pooled = jnp.tanh(last_hidden[:, 0, :] @ params["pool_w"] + params["pool_b"])

    out = {"last_hidden_state": last_hidden, "pooler_output": pooled}
    if output_hidden_states:
        out["hidden_states"] = tuple(all_hidden)
    return out


class BertModelforBaseline:
    """Mirrors the PyTorch wrapper: forward(inputs, labels=None, output_hidden_states=False)."""

    def __init__(self, params):
        self.params = params

    def forward(self, inputs, labels=None, output_hidden_states=False):
        return bert_forward(
            self.params,
            inputs["input_ids"],
            inputs["token_type_ids"],
            inputs["attention_mask"],
            output_hidden_states=output_hidden_states,
        )

    __call__ = forward


# ---------------------------------- main ----------------------------------
if __name__ == "__main__":
    key = jax.random.PRNGKey(0)
    pkey, ikey = jax.random.split(key)

    params = init_params(pkey)
    model = BertModelforBaseline(params)

    B, S = 2, 8
    input_ids = jax.random.randint(ikey, (B, S), 0, VOCAB, dtype=jnp.int32)
    token_type_ids = jnp.zeros((B, S), dtype=jnp.int32)
    attention_mask = jnp.ones((B, S), dtype=jnp.int32)

    inputs = {
        "input_ids": input_ids,
        "token_type_ids": token_type_ids,
        "attention_mask": attention_mask,
    }

    out = model(inputs, output_hidden_states=True)
    jax.block_until_ready(out["last_hidden_state"])
    jax.block_until_ready(out["pooler_output"])
    assert out["last_hidden_state"].shape == (B, S, HIDDEN)
    assert out["pooler_output"].shape == (B, HIDDEN)
    assert len(out["hidden_states"]) == N_LAYERS + 1
    assert bool(jnp.all(jnp.isfinite(out["last_hidden_state"])))
    print("KERNEL_OK")
</pallas_src>

<mosaic_0001>
module attributes {stable_mosaic.version = 11 : i64} {
  func.func @_emb_ln_kernel(%arg0: memref<16x32xf32, #tpu.memory_space<vmem>>, %arg1: memref<1x32xf32, #tpu.memory_space<vmem>>, %arg2: memref<1x32xf32, #tpu.memory_space<vmem>>, %arg3: memref<16x32xf32, #tpu.memory_space<vmem>>) attributes {dimension_semantics = [], scalar_prefetch = 0 : i64, scratch_operands = 0 : i64, tpu.core_type = #tpu.core_type<tc>} {
    %c0 = arith.constant 0 : index
    %c0_0 = arith.constant 0 : index
    %0 = vector.load %arg0[%c0, %c0_0] : memref<16x32xf32, #tpu.memory_space<vmem>>, vector<16x32xf32>
    %c0_1 = arith.constant 0 : index
    %c0_2 = arith.constant 0 : index
    %1 = vector.load %arg1[%c0_1, %c0_2] : memref<1x32xf32, #tpu.memory_space<vmem>>, vector<1x32xf32>
    %c0_3 = arith.constant 0 : index
    %c0_4 = arith.constant 0 : index
    %2 = vector.load %arg2[%c0_3, %c0_4] : memref<1x32xf32, #tpu.memory_space<vmem>>, vector<1x32xf32>
    %cst = arith.constant dense<0.000000e+00> : vector<16xf32>
    %3 = vector.multi_reduction <add>, %0, %cst [1] : vector<16x32xf32> to vector<16xf32>
    %4 = vector.shape_cast %3 : vector<16xf32> to vector<16x1xf32>
    %cst_5 = arith.constant 3.200000e+01 : f32
    %5 = vector.broadcast %cst_5 : f32 to vector<16x1xf32>
    %6 = arith.divf %4, %5 : vector<16x1xf32>
    %7 = vector.broadcast %6 : vector<16x1xf32> to vector<16x32xf32>
    %8 = arith.subf %0, %7 : vector<16x32xf32>
    %9 = vector.broadcast %6 : vector<16x1xf32> to vector<16x32xf32>
    %10 = arith.subf %0, %9 : vector<16x32xf32>
    %11 = arith.mulf %8, %10 : vector<16x32xf32>
    %cst_6 = arith.constant dense<0.000000e+00> : vector<16xf32>
    %12 = vector.multi_reduction <add>, %11, %cst_6 [1] : vector<16x32xf32> to vector<16xf32>
    %13 = vector.shape_cast %12 : vector<16xf32> to vector<16x1xf32>
    %cst_7 = arith.constant 3.200000e+01 : f32
    %14 = vector.broadcast %cst_7 : f32 to vector<16x1xf32>
    %15 = arith.divf %13, %14 : vector<16x1xf32>
    %16 = vector.broadcast %6 : vector<16x1xf32> to vector<16x32xf32>
    %17 = arith.subf %0, %16 : vector<16x32xf32>
    %cst_8 = arith.constant 9.99999996E-13 : f32
    %18 = vector.broadcast %cst_8 : f32 to vector<16x1xf32>
    %19 = arith.addf %15, %18 : vector<16x1xf32>
    %20 = math.rsqrt %19 : vector<16x1xf32>
    %21 = vector.broadcast %20 : vector<16x1xf32> to vector<16x32xf32>
    %22 = arith.mulf %17, %21 : vector<16x32xf32>
    %23 = vector.broadcast %1 : vector<1x32xf32> to vector<16x32xf32>
    %24 = arith.mulf %22, %23 : vector<16x32xf32>
    %25 = vector.broadcast %2 : vector<1x32xf32> to vector<16x32xf32>
    %26 = arith.addf %24, %25 : vector<16x32xf32>
    %c0_9 = arith.constant 0 : index
    %c0_10 = arith.constant 0 : index
    %27 = vector.load %arg3[%c0_9, %c0_10] : memref<16x32xf32, #tpu.memory_space<vmem>>, vector<16x32xf32>
    tpu.vector_store %arg3[%c0_9, %c0_10], %26 {strides = array<i32>} : memref<16x32xf32, #tpu.memory_space<vmem>>, vector<16x32xf32>,
    return
  }
}

module attributes {stable_mosaic.version = 11 : i64} {
  func.func @_layer_kernel(%arg0: memref<16x32xf32, #tpu.memory_space<vmem>>, %arg1: memref<16x16xf32, #tpu.memory_space<vmem>>, %arg2: memref<32x96xf32, #tpu.memory_space<vmem>>, %arg3: memref<1x96xf32, #tpu.memory_space<vmem>>, %arg4: memref<32x32xf32, #tpu.memory_space<vmem>>, %arg5: memref<1x32xf32, #tpu.memory_space<vmem>>, %arg6: memref<1x32xf32, #tpu.memory_space<vmem>>, %arg7: memref<1x32xf32, #tpu.memory_space<vmem>>, %arg8: memref<32x64xf32, #tpu.memory_space<vmem>>, %arg9: memref<1x64xf32, #tpu.memory_space<vmem>>, %arg10: memref<64x32xf32, #tpu.memory_space<vmem>>, %arg11: memref<1x32xf32, #tpu.memory_space<vmem>>, %arg12: memref<1x32xf32, #tpu.memory_space<vmem>>, %arg13: memref<1x32xf32, #tpu.memory_space<vmem>>, %arg14: memref<16x32xf32, #tpu.memory_space<vmem>>) attributes {dimension_semantics = [], scalar_prefetch = 0 : i64, scratch_operands = 0 : i64, tpu.core_type = #tpu.core_type<tc>} {
    %c0 = arith.constant 0 : index
    %c0_0 = arith.constant 0 : index
    %0 = vector.load %arg0[%c0, %c0_0] : memref<16x32xf32, #tpu.memory_space<vmem>>, vector<16x32xf32>
    %1 = arith.truncf %0 : vector<16x32xf32> to vector<16x32xbf16>
    %c0_1 = arith.constant 0 : index
    %c0_2 = arith.constant 0 : index
    %2 = vector.load %arg2[%c0_1, %c0_2] : memref<32x96xf32, #tpu.memory_space<vmem>>, vector<32x96xf32>
    %3 = arith.truncf %2 : vector<32x96xf32> to vector<32x96xbf16>
    %cst = arith.constant dense<0.000000e+00> : vector<16x96xf32>
    %4 = tpu.matmul %1, %3, %cst {dimension_numbers = #tpu.dot_dimension_numbers<[1], [0], [0], [1], [0, 0, 1, 1], [], []>} : vector<16x32xbf16>, vector<32x96xbf16>, vector<16x96xf32> -> vector<16x96xf32>
    %c0_3 = arith.constant 0 : index
    %c0_4 = arith.constant 0 : index
    %5 = vector.load %arg3[%c0_3, %c0_4] : memref<1x96xf32, #tpu.memory_space<vmem>>, vector<1x96xf32>
    %6 = vector.broadcast %5 : vector<1x96xf32> to vector<16x96xf32>
    %7 = arith.addf %4, %6 : vector<16x96xf32>
    %c0_5 = arith.constant 0 : index
    %c0_6 = arith.constant 0 : index
    %8 = vector.load %arg1[%c0_5, %c0_6] : memref<16x16xf32, #tpu.memory_space<vmem>>, vector<16x16xf32>
    %c0_7 = arith.constant 0 : index
    %c0_8 = arith.constant 0 : index
    %9 = vector.load %arg4[%c0_7, %c0_8] : memref<32x32xf32, #tpu.memory_space<vmem>>, vector<32x32xf32>
    %cst_9 = arith.constant 0.000000e+00 : f32
    %10 = vector.broadcast %cst_9 : f32 to vector<16x32xf32>
    %11 = vector.extract_strided_slice %7 {offsets = [0, 0], sizes = [16, 16], strides = [1, 1]} : vector<16x96xf32> to vector<16x16xf32>
    %12 = vector.extract_strided_slice %7 {offsets = [0, 32], sizes = [16, 16], strides = [1, 1]} : vector<16x96xf32> to vector<16x16xf32>
    %13 = vector.extract_strided_slice %7 {offsets = [0, 64], sizes = [16, 16], strides = [1, 1]} : vector<16x96xf32> to vector<16x16xf32>
    %14 = arith.truncf %11 : vector<16x16xf32> to vector<16x16xbf16>
    %15 = arith.truncf %12 : vector<16x16xf32> to vector<16x16xbf16>
    %cst_10 = arith.constant dense<0.000000e+00> : vector<16x16xf32>
    %16 = tpu.matmul %14, %15, %cst_10 {dimension_numbers = #tpu.dot_dimension_numbers<[1], [1], [0], [0], [0, 0, 1, 0], [], []>} : vector<16x16xbf16>, vector<16x16xbf16>, vector<16x16xf32> -> vector<16x16xf32>
    %cst_11 = arith.constant 2.500000e-01 : f32
    %17 = vector.broadcast %cst_11 : f32 to vector<16x16xf32>
    %18 = arith.mulf %16, %17 : vector<16x16xf32>
    %19 = arith.addf %18, %8 : vector<16x16xf32>
    %cst_12 = arith.constant dense<0xFF800000> : vector<16xf32>
    %20 = vector.multi_reduction <maximumf>, %19, %cst_12 [1] : vector<16x16xf32> to vector<16xf32>
    %21 = vector.shape_cast %20 : vector<16xf32> to vector<16x1xf32>
    %22 = vector.broadcast %21 : vector<16x1xf32> to vector<16x16xf32>
    %23 = arith.subf %19, %22 : vector<16x16xf32>
    %24 = math.exp %23 : vector<16x16xf32>
    %cst_13 = arith.constant dense<0.000000e+00> : vector<16xf32>
    %25 = vector.multi_reduction <add>, %24, %cst_13 [1] : vector<16x16xf32> to vector<16xf32>
    %26 = vector.shape_cast %25 : vector<16xf32> to vector<16x1xf32>
    %27 = tpu.reciprocal %26 {approx = true} : vector<16x1xf32> -> vector<16x1xf32>
    %28 = vector.broadcast %27 : vector<16x1xf32> to vector<16x16xf32>
    %29 = arith.mulf %24, %28 : vector<16x16xf32>
    %30 = arith.truncf %29 : vector<16x16xf32> to vector<16x16xbf16>
    %31 = arith.truncf %13 : vector<16x16xf32> to vector<16x16xbf16>
    %cst_14 = arith.constant dense<0.000000e+00> : vector<16x16xf32>
    %32 = tpu.matmul %30, %31, %cst_14 {dimension_numbers = #tpu.dot_dimension_numbers<[1], [0], [0], [1], [0, 0, 1, 1], [], []>} : vector<16x16xbf16>, vector<16x16xbf16>, vector<16x16xf32> -> vector<16x16xf32>
    %33 = arith.truncf %32 : vector<16x16xf32> to vector<16x16xbf16>
    %34 = vector.extract_strided_slice %9 {offsets = [0, 0], sizes = [16, 32], strides = [1, 1]} : vector<32x32xf32> to vector<16x32xf32>
    %35 = arith.truncf %34 : vector<16x32xf32> to vector<16x32xbf16>
    %cst_15 = arith.constant dense<0.000000e+00> : vector<16x32xf32>
    %36 = tpu.matmul %33, %35, %cst_15 {dimension_numbers = #tpu.dot_dimension_numbers<[1], [0], [0], [1], [0, 0, 1, 1], [], []>} : vector<16x16xbf16>, vector<16x32xbf16>, vector<16x32xf32> -> vector<16x32xf32>
    %37 = arith.addf %10, %36 : vector<16x32xf32>
    %38 = vector.extract_strided_slice %7 {offsets = [0, 16], sizes = [16, 16], strides = [1, 1]} : vector<16x96xf32> to vector<16x16xf32>
    %39 = vector.extract_strided_slice %7 {offsets = [0, 48], sizes = [16, 16], strides = [1, 1]} : vector<16x96xf32> to vector<16x16xf32>
    %40 = vector.extract_strided_slice %7 {offsets = [0, 80], sizes = [16, 16], strides = [1, 1]} : vector<16x96xf32> to vector<16x16xf32>
    %41 = arith.truncf %38 : vector<16x16xf32> to vector<16x16xbf16>
    %42 = arith.truncf %39 : vector<16x16xf32> to vector<16x16xbf16>
    %cst_16 = arith.constant dense<0.000000e+00> : vector<16x16xf32>
    %43 = tpu.matmul %41, %42, %cst_16 {dimension_numbers = #tpu.dot_dimension_numbers<[1], [1], [0], [0], [0, 0, 1, 0], [], []>} : vector<16x16xbf16>, vector<16x16xbf16>, vector<16x16xf32> -> vector<16x16xf32>
    %cst_17 = arith.constant 2.500000e-01 : f32
    %44 = vector.broadcast %cst_17 : f32 to vector<16x16xf32>
    %45 = arith.mulf %43, %44 : vector<16x16xf32>
    %46 = arith.addf %45, %8 : vector<16x16xf32>
    %cst_18 = arith.constant dense<0xFF800000> : vector<16xf32>
    %47 = vector.multi_reduction <maximumf>, %46, %cst_18 [1] : vector<16x16xf32> to vector<16xf32>
    %48 = vector.shape_cast %47 : vector<16xf32> to vector<16x1xf32>
    %49 = vector.broadcast %48 : vector<16x1xf32> to vector<16x16xf32>
    %50 = arith.subf %46, %49 : vector<16x16xf32>
    %51 = math.exp %50 : vector<16x16xf32>
    %cst_19 = arith.constant dense<0.000000e+00> : vector<16xf32>
    %52 = vector.multi_reduction <add>, %51, %cst_19 [1] : vector<16x16xf32> to vector<16xf32>
    %53 = vector.shape_cast %52 : vector<16xf32> to vector<16x1xf32>
    %54 = tpu.reciprocal %53 {approx = true} : vector<16x1xf32> -> vector<16x1xf32>
    %55 = vector.broadcast %54 : vector<16x1xf32> to vector<16x16xf32>
    %56 = arith.mulf %51, %55 : vector<16x16xf32>
    %57 = arith.truncf %56 : vector<16x16xf32> to vector<16x16xbf16>
    %58 = arith.truncf %40 : vector<16x16xf32> to vector<16x16xbf16>
    %cst_20 = arith.constant dense<0.000000e+00> : vector<16x16xf32>
    %59 = tpu.matmul %57, %58, %cst_20 {dimension_numbers = #tpu.dot_dimension_numbers<[1], [0], [0], [1], [0, 0, 1, 1], [], []>} : vector<16x16xbf16>, vector<16x16xbf16>, vector<16x16xf32> -> vector<16x16xf32>
    %60 = arith.truncf %59 : vector<16x16xf32> to vector<16x16xbf16>
    %61 = vector.extract_strided_slice %9 {offsets = [16, 0], sizes = [16, 32], strides = [1, 1]} : vector<32x32xf32> to vector<16x32xf32>
    %62 = arith.truncf %61 : vector<16x32xf32> to vector<16x32xbf16>
    %cst_21 = arith.constant dense<0.000000e+00> : vector<16x32xf32>
    %63 = tpu.matmul %60, %62, %cst_21 {dimension_numbers = #tpu.dot_dimension_numbers<[1], [0], [0], [1], [0, 0, 1, 1], [], []>} : vector<16x16xbf16>, vector<16x32xbf16>, vector<16x32xf32> -> vector<16x32xf32>
    %64 = arith.addf %37, %63 : vector<16x32xf32>
    %c0_22 = arith.constant 0 : index
    %c0_23 = arith.constant 0 : index
    %65 = vector.load %arg5[%c0_22, %c0_23] : memref<1x32xf32, #tpu.memory_space<vmem>>, vector<1x32xf32>
    %66 = vector.broadcast %65 : vector<1x32xf32> to vector<16x32xf32>
    %67 = arith.addf %64, %66 : vector<16x32xf32>
    %68 = arith.addf %67, %0 : vector<16x32xf32>
    %c0_24 = arith.constant 0 : index
    %c0_25 = arith.constant 0 : index
    %69 = vector.load %arg6[%c0_24, %c0_25] : memref<1x32xf32, #tpu.memory_space<vmem>>, vector<1x32xf32>
    %c0_26 = arith.constant 0 : index
    %c0_27 = arith.constant 0 : index
    %70 = vector.load %arg7[%c0_26, %c0_27] : memref<1x32xf32, #tpu.memory_space<vmem>>, vector<1x32xf32>
    %cst_28 = arith.constant dense<0.000000e+00> : vector<16xf32>
    %71 = vector.multi_reduction <add>, %68, %cst_28 [1] : vector<16x32xf32> to vector<16xf32>
    %72 = vector.shape_cast %71 : vector<16xf32> to vector<16x1xf32>
    %cst_29 = arith.constant 3.200000e+01 : f32
    %73 = vector.broadcast %cst_29 : f32 to vector<16x1xf32>
    %74 = arith.divf %72, %73 : vector<16x1xf32>
    %75 = vector.broadcast %74 : vector<16x1xf32> to vector<16x32xf32>
    %76 = arith.subf %68, %75 : vector<16x32xf32>
    %77 = vector.broadcast %74 : vector<16x1xf32> to vector<16x32xf32>
    %78 = arith.subf %68, %77 : vector<16x32xf32>
    %79 = arith.mulf %76, %78 : vector<16x32xf32>
    %cst_30 = arith.constant dense<0.000000e+00> : vector<16xf32>
    %80 = vector.multi_reduction <add>, %79, %cst_30 [1] : vector<16x32xf32> to vector<16xf32>
    %81 = vector.shape_cast %80 : vector<16xf32> to vector<16x1xf32>
    %cst_31 = arith.constant 3.200000e+01 : f32
    %82 = vector.broadcast %cst_31 : f32 to vector<16x1xf32>
    %83 = arith.divf %81, %82 : vector<16x1xf32>
    %84 = vector.broadcast %74 : vector<16x1xf32> to vector<16x32xf32>
    %85 = arith.subf %68, %84 : vector<16x32xf32>
    %cst_32 = arith.constant 9.99999996E-13 : f32
    %86 = vector.broadcast %cst_32 : f32 to vector<16x1xf32>
    %87 = arith.addf %83, %86 : vector<16x1xf32>
    %88 = math.rsqrt %87 : vector<16x1xf32>
    %89 = vector.broadcast %88 : vector<16x1xf32> to vector<16x32xf32>
    %90 = arith.mulf %85, %89 : vector<16x32xf32>
    %91 = vector.broadcast %69 : vector<1x32xf32> to vector<16x32xf32>
    %92 = arith.mulf %90, %91 : vector<16x32xf32>
    %93 = vector.broadcast %70 : vector<1x32xf32> to vector<16x32xf32>
    %94 = arith.addf %92, %93 : vector<16x32xf32>
    %95 = arith.truncf %94 : vector<16x32xf32> to vector<16x32xbf16>
    %c0_33 = arith.constant 0 : index
    %c0_34 = arith.constant 0 : index
    %96 = vector.load %arg8[%c0_33, %c0_34] : memref<32x64xf32, #tpu.memory_space<vmem>>, vector<32x64xf32>
    %97 = arith.truncf %96 : vector<32x64xf32> to vector<32x64xbf16>
    %cst_35 = arith.constant dense<0.000000e+00> : vector<16x64xf32>
    %98 = tpu.matmul %95, %97, %cst_35 {dimension_numbers = #tpu.dot_dimension_numbers<[1], [0], [0], [1], [0, 0, 1, 1], [], []>} : vector<16x32xbf16>, vector<32x64xbf16>, vector<16x64xf32> -> vector<16x64xf32>
    %c0_36 = arith.constant 0 : index
    %c0_37 = arith.constant 0 : index
    %99 = vector.load %arg9[%c0_36, %c0_37] : memref<1x64xf32, #tpu.memory_space<vmem>>, vector<1x64xf32>
    %100 = vector.broadcast %99 : vector<1x64xf32> to vector<16x64xf32>
    %101 = arith.addf %98, %100 : vector<16x64xf32>
    %cst_38 = arith.constant 5.000000e-01 : f32
    %102 = vector.broadcast %cst_38 : f32 to vector<16x64xf32>
    %103 = arith.mulf %102, %101 : vector<16x64xf32>
    %cst_39 = arith.constant 4.471500e-02 : f32
    %104 = vector.broadcast %cst_39 : f32 to vector<16x64xf32>
    %105 = arith.mulf %104, %101 : vector<16x64xf32>
    %106 = arith.mulf %105, %101 : vector<16x64xf32>
    %107 = arith.mulf %106, %101 : vector<16x64xf32>
    %108 = arith.addf %101, %107 : vector<16x64xf32>
    %cst_40 = arith.constant 0.797884583 : f32
    %109 = vector.broadcast %cst_40 : f32 to vector<16x64xf32>
    %110 = arith.mulf %109, %108 : vector<16x64xf32>
    %111 = math.tanh %110 : vector<16x64xf32>
    %cst_41 = arith.constant 1.000000e+00 : f32
    %112 = vector.broadcast %cst_41 : f32 to vector<16x64xf32>
    %113 = arith.addf %112, %111 : vector<16x64xf32>
    %114 = arith.mulf %103, %113 : vector<16x64xf32>
    %115 = arith.truncf %114 : vector<16x64xf32> to vector<16x64xbf16>
    %c0_42 = arith.constant 0 : index
    %c0_43 = arith.constant 0 : index
    %116 = vector.load %arg10[%c0_42, %c0_43] : memref<64x32xf32, #tpu.memory_space<vmem>>, vector<64x32xf32>
    %117 = arith.truncf %116 : vector<64x32xf32> to vector<64x32xbf16>
    %cst_44 = arith.constant dense<0.000000e+00> : vector<16x32xf32>
    %118 = tpu.matmul %115, %117, %cst_44 {dimension_numbers = #tpu.dot_dimension_numbers<[1], [0], [0], [1], [0, 0, 1, 1], [], []>} : vector<16x64xbf16>, vector<64x32xbf16>, vector<16x32xf32> -> vector<16x32xf32>
    %c0_45 = arith.constant 0 : index
    %c0_46 = arith.constant 0 : index
    %119 = vector.load %arg11[%c0_45, %c0_46] : memref<1x32xf32, #tpu.memory_space<vmem>>, vector<1x32xf32>
    %120 = vector.broadcast %119 : vector<1x32xf32> to vector<16x32xf32>
    %121 = arith.addf %118, %120 : vector<16x32xf32>
    %122 = arith.addf %121, %94 : vector<16x32xf32>
    %c0_47 = arith.constant 0 : index
    %c0_48 = arith.constant 0 : index
    %123 = vector.load %arg12[%c0_47, %c0_48] : memref<1x32xf32, #tpu.memory_space<vmem>>, vector<1x32xf32>
    %c0_49 = arith.constant 0 : index
    %c0_50 = arith.constant 0 : index
    %124 = vector.load %arg13[%c0_49, %c0_50] : memref<1x32xf32, #tpu.memory_space<vmem>>, vector<1x32xf32>
    %cst_51 = arith.constant dense<0.000000e+00> : vector<16xf32>
    %125 = vector.multi_reduction <add>, %122, %cst_51 [1] : vector<16x32xf32> to vector<16xf32>
    %126 = vector.shape_cast %125 : vector<16xf32> to vector<16x1xf32>
    %cst_52 = arith.constant 3.200000e+01 : f32
    %127 = vector.broadcast %cst_52 : f32 to vector<16x1xf32>
    %128 = arith.divf %126, %127 : vector<16x1xf32>
    %129 = vector.broadcast %128 : vector<16x1xf32> to vector<16x32xf32>
    %130 = arith.subf %122, %129 : vector<16x32xf32>
    %131 = vector.broadcast %128 : vector<16x1xf32> to vector<16x32xf32>
    %132 = arith.subf %122, %131 : vector<16x32xf32>
    %133 = arith.mulf %130, %132 : vector<16x32xf32>
    %cst_53 = arith.constant dense<0.000000e+00> : vector<16xf32>
    %134 = vector.multi_reduction <add>, %133, %cst_53 [1] : vector<16x32xf32> to vector<16xf32>
    %135 = vector.shape_cast %134 : vector<16xf32> to vector<16x1xf32>
    %cst_54 = arith.constant 3.200000e+01 : f32
    %136 = vector.broadcast %cst_54 : f32 to vector<16x1xf32>
    %137 = arith.divf %135, %136 : vector<16x1xf32>
    %138 = vector.broadcast %128 : vector<16x1xf32> to vector<16x32xf32>
    %139 = arith.subf %122, %138 : vector<16x32xf32>
    %cst_55 = arith.constant 9.99999996E-13 : f32
    %140 = vector.broadcast %cst_55 : f32 to vector<16x1xf32>
    %141 = arith.addf %137, %140 : vector<16x1xf32>
    %142 = math.rsqrt %141 : vector<16x1xf32>
    %143 = vector.broadcast %142 : vector<16x1xf32> to vector<16x32xf32>
    %144 = arith.mulf %139, %143 : vector<16x32xf32>
    %145 = vector.broadcast %123 : vector<1x32xf32> to vector<16x32xf32>
    %146 = arith.mulf %144, %145 : vector<16x32xf32>
    %147 = vector.broadcast %124 : vector<1x32xf32> to vector<16x32xf32>
    %148 = arith.addf %146, %147 : vector<16x32xf32>
    %c0_56 = arith.constant 0 : index
    %c0_57 = arith.constant 0 : index
    %149 = vector.load %arg14[%c0_56, %c0_57] : memref<16x32xf32, #tpu.memory_space<vmem>>, vector<16x32xf32>
    tpu.vector_store %arg14[%c0_56, %c0_57], %148 {strides = array<i32>} : memref<16x32xf32, #tpu.memory_space<vmem>>, vector<16x32xf32>,
    return
  }
}

</mosaic_0001>

<bundles_post_ra>
// kernel: bert_forward.3
= control target key start
LH: loop header
LB: loop body
LE: loop exit
PB: predicated region body
PF: predicated region fallthrough
CT: control target
= control target key end

     0   :  { %vm18_vm0 = vcmask 261120   ;;  %s118_s0 = inlined_call_operand.vmem [shape: f32[16,32], index: 0, kind: input, shape index: {}]   ;;  %s119_s1 = inlined_call_operand.vmem [shape: f32[1,32], index: 1, kind: input, shape index: {}]   ;;  %s120_s2 = inlined_call_operand.vmem [shape: f32[1,32], index: 2, kind: input, shape index: {}]   ;;  %s121_s3 = inlined_call_operand.vmem [shape: f32[16,32], index: 3, kind: output, shape index: {}]  }
   0x1   :  { %v14_v0 = vld [vmem:[%s118_s0] sm:$0xff]  ;;  %v15_v1 = vld [vmem:[%s118_s0 + $0x8] sm:$0xff] }
   0x2   :  { %v19_v2 = vsel %vm18_vm0, %v14_v0, 0.0  ;;  %v22_v3 = vsel %vm18_vm0, %v15_v1, 0.0  ;;  %v68_v21 = vld [vmem:[%s119_s1] ss:$0 sm:$0xff] }
   0x3   :  { %20 = vadd.xlane.f32.xlu0 %v19_v2  ;;  %v69_v23 = vld [vmem:[%s120_s2] ss:$0 sm:$0xff] }
   0x7   :  { %23 = vadd.xlane.f32.xlu0 %v22_v3 }
  0x90   :  { %v21_v4 = vpop.xlane.xlu0 %20 }
  0x91   :  { %v26_v5 = vmul.f32 0.03125, %v21_v4 }
  0x93   :  { %v28_v6 = vsub.f32 %v14_v0, %v26_v5 }
  0x94   :  { %v24_v7 = vpop.xlane.xlu0 %23 }
  0x95   :  { %v27_v8 = vmul.f32 0.03125, %v24_v7  ;;  %v30_v9 = vmul.f32 %v28_v6, %v28_v6 }
  0x97   :  { %v29_v10 = vsub.f32 %v15_v1, %v27_v8  ;;  %v32_v11 = vsel %vm18_vm0, %v30_v9, 0.0 }
  0x98   :  { %33 = vadd.xlane.f32.xlu1 %v32_v11 }
  0x99   :  { %v31_v12 = vmul.f32 %v29_v10, %v29_v10 }
  0x9b   :  { %v35_v13 = vsel %vm18_vm0, %v31_v12, 0.0 }
  0x9c   :  { %36 = vadd.xlane.f32.xlu1 %v35_v13 }
 0x125   :  { %v34_v14 = vpop.xlane.xlu1 %33 }
 0x126   :  { %v38_v15 = vmul.f32 0.03125, %v34_v14 }
 0x128   :  { %v40_v16 = vadd.f32 1e-12, %v38_v15 }
 0x129   :  { %v37_v17 = vpop.xlane.xlu1 %36 }
 0x12a   :  { %70 = vrsqrt.f32 %v40_v16  ;;  %v39_v18 = vmul.f32 0.03125, %v37_v17 }
 0x12c   :  { %v41_v19 = vadd.f32 1e-12, %v39_v18 }
 0x12e   :  { %72 = vrsqrt.f32 %v41_v19 }
 0x134   :  { %v71_v20 = vpop.eup %70 }
 0x135   :  { %v44_v22 = vmul.f32 %v71_v20, %v28_v6 }
 0x137   :  { %v52_v24 = vmul.f32 %v68_v21, %v44_v22 }
 0x138   :  { %v73_v25 = vpop.eup %72 }
 0x139   :  { %v60_v26 = vadd.f32 %v69_v23, %v52_v24  ;;  %v45_v27 = vmul.f32 %v73_v25, %v29_v10 }
 0x13b   :  { %62 = vst.msk [vmem:[%s121_s3] sm:$0xff] %vm18_vm0, %v60_v26  ;;  %v53_v28 = vmul.f32 %v68_v21, %v45_v27 }
 0x13d   :  { %v61_v29 = vadd.f32 %v69_v23, %v53_v28 }
 0x13f   :  { %63 = vst.msk [vmem:[%s121_s3 + $0x8] sm:$0xff] %vm18_vm0, %v61_v29 }

// kernel: bert_forward.4
= control target key start
LH: loop header
LB: loop body
LE: loop exit
PB: predicated region body
PF: predicated region fallthrough
CT: control target
= control target key end

     0   :  { %v846_v0 = vmov 0.0   ;;  %vm847_vm0 = vmmov 0   ;;  %vm64_vm1 = vcmask 261120   ;;  %s849_s26 = smov 96   ;;  %s850_s27 = smov 80   ;;  %vm119_vm2 = vcmask 130048   ;;  %s1114_s2 = inlined_call_operand.vmem [shape: f32[32,96], index: 2, kind: input, shape index: {}]   ;;  %s1115_s0 = inlined_call_operand.vmem [shape: f32[16,32], index: 0, kind: input, shape index: {}]   ;;  %s1116_s3 = inlined_call_operand.vmem [shape: f32[1,96], index: 3, kind: input, shape index: {}]   ;;  %s1117_s1 = inlined_call_operand.vmem [shape: f32[16,16], index: 1, kind: input, shape index: {}]   ;;  %s1118_s4 = inlined_call_operand.vmem [shape: f32[32,32], index: 4, kind: input, shape index: {}]   ;;  %s1119_s5 = inlined_call_operand.vmem [shape: f32[1,32], index: 5, kind: input, shape index: {}]   ;;  %s1120_s8 = inlined_call_operand.vmem [shape: f32[32,64], index: 8, kind: input, shape index: {}]   ;;  %s1121_s6 = inlined_call_operand.vmem [shape: f32[1,32], index: 6, kind: input, shape index: {}]   ;;  %s1122_s7 = inlined_call_operand.vmem [shape: f32[1,32], index: 7, kind: input, shape index: {}]   ;;  %s1123_s10 = inlined_call_operand.vmem [shape: f32[64,32], index: 10, kind: input, shape index: {}]   ;;  %s1124_s9 = inlined_call_operand.vmem [shape: f32[1,64], index: 9, kind: input, shape index: {}]   ;;  %s1125_s11 = inlined_call_operand.vmem [shape: f32[1,32], index: 11, kind: input, shape index: {}]   ;;  %s1126_s12 = inlined_call_operand.vmem [shape: f32[1,32], index: 12, kind: input, shape index: {}]   ;;  %s1127_s13 = inlined_call_operand.vmem [shape: f32[1,32], index: 13, kind: input, shape index: {}]   ;;  %s1128_s14 = inlined_call_operand.vmem [shape: f32[16,32], index: 14, kind: output, shape index: {}]  }
   0x1   :  { %747 = vmatprep.subr.bf16.mxu1 %v846_v0  ;;  %v51_v1 = vld [vmem:[%s1114_s2] sm:$0xff]  ;;  %v52_v2 = vld [vmem:[%s1114_s2 + $0x8] sm:$0xff]  ;;  %v53_v3 = vld [vmem:[%s1114_s2 + $0x10] sm:$0xff]  ;;  %751 = vmatprep.mubr.msk.bf16.mxu1 %vm847_vm0, %v846_v0  ;;  %s852_s15 = smov 64   ;;  %vm610_vm3 = vcmask 523264  }
   0x2   :  { %v55_v4 = vpack.c.bf16 %v52_v2, %v51_v1  ;;  %v54_v5 = vld [vmem:[%s1114_s2 + $0x18] sm:$0xff]  ;;  %761 = vmatprep.subr.bf16.mxu0 %v846_v0  ;;  %763 = vmatprep.mubr.msk.bf16.mxu0 %vm847_vm0, %v846_v0  ;;  %v949_v7 = vld [vmem:[%s1115_s0] sm:$0xff]  ;;  %v954_v8 = vld [vmem:[%s1115_s0 + $0x8] sm:$0xff]  ;;  %s848_s0 = smov 112  }
   0x3   :  { %v56_v6 = vpack.c.bf16 %v54_v5, %v53_v3  ;;  %v50_v9 = vpack.c.bf16 %v954_v8, %v949_v7  ;;  %v707_v10 = vld [vmem:[%s1116_s3] ss:$0 sm:$0xff]  ;;  %v110_v28 = vld [vmem:[%s1117_s1 + $0x8] sm:$0xff] }
   0x4   :  { %748 = vmatpush3.bf16.msra.mxu1 %v55_v4  ;;  %v109_v24 = vld [vmem:[%s1117_s1] sm:$0xff]  ;;  %s851_s1 = smov 48  }
   0x5   :  { %749 = vmatprep.subr.bf16.mxu1 %v846_v0 }
   0x8   :  { %750 = vmatpush3.bf16.msra.mxu1 %v56_v6 }
   0x9   :  { %755 = vmatprep.subr.bf16.mxu1 %v846_v0 }
   0xb   :  { %752 = vmatmul.mubr.msk.bf16.vlgmr.msra.gmra.mrb[0].mxu1 %vm64_vm1, %v50_v9 }
   0xc   :  { %757 = vmatprep.mubr.msk.bf16.mxu1 %vm847_vm0, %v846_v0 }
  0xde   :  { %v102_v11 = vpop.f32.mrb[0].mxu1 }
  0xdf   :  { %v753_v12 = vpop.f32.mrb[1].mxu1  ;;  %v103_v14 = vadd.f32 %v707_v10, %v102_v11 }
  0xe0   :  { %v105_v13 = vpop.f32.mrb[2].mxu1 }
  0xe1   :  { %v106_v15 = vadd.f32 %v707_v10, %v105_v13  ;;  %v754_v16 = vpop.f32.mrb[3].mxu1 }
  0xe3   :  { %v966_v17 = vpack.c.bf16 %v106_v15, %v103_v14 }
  0xe5   :  { %243 = vrot.lane.b32.xlu1 %v966_v17, %s848_s0  ;;  %117 = vrot.lane.b32.xlu0 %v966_v17, %s849_s26 }
  0xe9   :  { %245 = vrot.lane.b32.xlu0 %v966_v17, %s850_s27 }
 0x157   :  { %v118_v18 = vpop.permute.xlu0 %117  ;;  %v244_v22 = vpop.permute.xlu1 %243 }
 0x158   :  { %v124_v19 = vsel %vm119_vm2, %v118_v18, 0 }
 0x159   :  { %756 = vmatpush3.bf16.xpose.msra.mxu1 %v124_v19 }
 0x15a   :  { %767 = vmatprep.subr.bf16.mxu1 %v846_v0 }
 0x15b   :  { %v246_v20 = vpop.permute.xlu0 %245 }
 0x15c   :  { %v251_v21 = vsel %vm119_vm2, %v246_v20, 0  ;;  %v111_v20 = vld [vmem:[%s1118_s4] sm:$0xff] }
 0x160   :  { %758 = vmatmul.mubr.msk.bf16.vlgmr.msra.gmra.mrb[4].mxu1 %vm119_vm2, %v966_v17 }
 0x161   :  { %768 = vmatpush3.bf16.xpose.msra.mxu1 %v251_v21  ;;  %769 = vmatprep.mubr.msk.bf16.mxu1 %vm847_vm0, %v846_v0  ;;  %v112_v21 = vld [vmem:[%s1118_s4 + $0x8] sm:$0xff] }
 0x162   :  { %779 = vmatprep.subr.bf16.mxu1 %v846_v0 }
 0x168   :  { %770 = vmatmul.mubr.msk.bf16.vlgmr.msra.gmra.mrb[8].mxu1 %vm119_vm2, %v244_v22  ;;  %v242_v22 = vpack.c.bf16 %v112_v21, %v111_v20 }
 0x169   :  { %781 = vmatprep.mubr.msk.bf16.mxu1 %vm847_vm0, %v846_v0 }
 0x233   :  { %v160_v23 = vpop.f32.mrb[4].mxu1 }
 0x234   :  { %v167_v25 = vmul.f32 0.25, %v160_v23  ;;  %v759_v26 = vpop.f32.mrb[5].mxu1  ;;  %v113_v23 = vld [vmem:[%s1118_s4 + $0x10] sm:$0xff] }
 0x235   :  { %v163_v27 = vpop.f32.mrb[6].mxu1 }
 0x236   :  { %v168_v29 = vmul.f32 0.25, %v163_v27  ;;  %v760_v30 = vpop.f32.mrb[7].mxu1  ;;  %v169_v31 = vadd.f32 %v167_v25, %v109_v24 }
 0x238   :  { %v171_v32 = vsel %vm119_vm2, %v169_v31, -inf  ;;  %v170_v33 = vadd.f32 %v168_v29, %v110_v28 }
 0x239   :  { %172 = vmax.xlane.f32.xlu1 %v171_v32 }
 0x23a   :  { %v174_v34 = vsel %vm119_vm2, %v170_v33, -inf }
 0x23b   :  { %175 = vmax.xlane.f32.xlu0 %v174_v34  ;;  %v287_v35 = vpop.f32.mrb[8].mxu1 }
 0x23c   :  { %v294_v36 = vmul.f32 0.25, %v287_v35  ;;  %v771_v37 = vpop.f32.mrb[9].mxu1 }
 0x23d   :  { %v290_v38 = vpop.f32.mrb[10].mxu1 }
 0x23e   :  { %v295_v39 = vmul.f32 0.25, %v290_v38  ;;  %v772_v40 = vpop.f32.mrb[11].mxu1  ;;  %v296_v41 = vadd.f32 %v294_v36, %v109_v24  ;;  %v114_v24 = vld [vmem:[%s1118_s4 + $0x18] sm:$0xff] }
 0x23f   :  { %v369_v25 = vpack.c.bf16 %v114_v24, %v113_v23  ;;  %v591_v23 = vld [vmem:[%s1123_s10] sm:$0xff]  ;;  %v592_v24 = vld [vmem:[%s1123_s10 + $0x8] sm:$0xff] }
 0x240   :  { %v298_v42 = vsel %vm119_vm2, %v296_v41, -inf  ;;  %v297_v43 = vadd.f32 %v295_v39, %v110_v28 }
 0x241   :  { %299 = vmax.xlane.f32.xlu0 %v298_v42  ;;  %780 = vmatpush3.bf16.msra.mxu1 %v369_v25  ;;  %v593_v25 = vld [vmem:[%s1123_s10 + $0x10] sm:$0xff] }
 0x242   :  { %v301_v44 = vsel %vm119_vm2, %v297_v43, -inf  ;;  %791 = vmatprep.subr.bf16.mxu1 %v846_v0 }
 0x243   :  { %302 = vmax.xlane.f32.xlu1 %v301_v44 }
 0x2c6   :  { %v173_v45 = vpop.xlane.xlu1 %172 }
 0x2c7   :  { %v177_v46 = vsub.f32 %v169_v31, %v173_v45 }
 0x2c8   :  { %v176_v47 = vpop.xlane.xlu0 %175 }
 0x2c9   :  { %v179_v48 = vmul.f32 1.442695, %v177_v46  ;;  %v178_v49 = vsub.f32 %v170_v33, %v176_v47 }
 0x2cb   :  { %818 = vpow2.f32 %v179_v48  ;;  %v181_v50 = vmul.f32 1.442695, %v178_v49 }
 0x2cd   :  { %820 = vpow2.f32 %v181_v50 }
 0x2ce   :  { %v300_v51 = vpop.xlane.xlu0 %299 }
 0x2cf   :  { %v304_v52 = vsub.f32 %v296_v41, %v300_v51  ;;  %v715_v41 = vld [vmem:[%s1119_s5] ss:$0 sm:$0xff] }
 0x2d0   :  { %v303_v53 = vpop.xlane.xlu1 %302 }
 0x2d1   :  { %v306_v54 = vmul.f32 1.442695, %v304_v52  ;;  %v305_v55 = vsub.f32 %v297_v43, %v303_v53 }
 0x2d3   :  { %822 = vpow2.f32 %v306_v54  ;;  %v308_v56 = vmul.f32 1.442695, %v305_v55 }
 0x2d5   :  { %v819_v57 = vpop.eup %818  ;;  %824 = vpow2.f32 %v308_v56 }
 0x2d6   :  { %v183_v58 = vsel %vm119_vm2, %v819_v57, 0.0 }
 0x2d7   :  { %v821_v59 = vpop.eup %820  ;;  %184 = vadd.xlane.f32.xlu0 %v183_v58 }
 0x2d8   :  { %v186_v60 = vsel %vm119_vm2, %v821_v59, 0.0 }
 0x2d9   :  { %187 = vadd.xlane.f32.xlu1 %v186_v60 }
 0x2dd   :  { %v823_v61 = vpop.eup %822 }
 0x2de   :  { %v310_v62 = vsel %vm119_vm2, %v823_v61, 0.0 }
 0x2df   :  { %v825_v63 = vpop.eup %824  ;;  %311 = vadd.xlane.f32.xlu0 %v310_v62  ;;  %v516_v62 = vld [vmem:[%s1120_s8 + $0x8] sm:$0xff] }
 0x2e0   :  { %v313_v1 = vsel %vm119_vm2, %v825_v63, 0.0 }
 0x2e1   :  { %314 = vadd.xlane.f32.xlu1 %v313_v1  ;;  %v517_v1 = vld [vmem:[%s1120_s8 + $0x10] sm:$0xff] }
 0x2f2   :  { %321 = vrot.lane.b32.xlu1 %v966_v17, %s851_s1 }
 0x2f5   :  { %194 = vrot.lane.b32.xlu0 %v966_v17, %s852_s15 }
 0x364   :  { %v185_v2 = vpop.xlane.xlu0 %184 }
 0x365   :  { %826 = vrcp.f32 %v185_v2  ;;  %v518_v2 = vld [vmem:[%s1120_s8 + $0x18] sm:$0xff] }
 0x366   :  { %v188_v3 = vpop.xlane.xlu1 %187 }
 0x367   :  { %828 = vrcp.f32 %v188_v3  ;;  %v520_v3 = vpack.c.bf16 %v518_v2, %v517_v1 }
 0x36c   :  { %v312_v4 = vpop.xlane.xlu0 %311 }
 0x36d   :  { %830 = vrcp.f32 %v312_v4 }
 0x36e   :  { %v315_v5 = vpop.xlane.xlu1 %314 }
 0x36f   :  { %v827_v6 = vpop.eup %826  ;;  %832 = vrcp.f32 %v315_v5 }
 0x370   :  { %v195_v9 = vpop.permute.xlu0 %194  ;;  %v191_v11 = vmul.f32 %v827_v6, %v819_v57 }
 0x371   :  { %v829_v10 = vpop.eup %828  ;;  %762 = vmatpush3.bf16.msra.mxu0 %v195_v9 }
 0x372   :  { %773 = vmatprep.subr.bf16.mxu0 %v846_v0  ;;  %v192_v12 = vmul.f32 %v829_v10, %v821_v59  ;;  %v322_v14 = vpop.permute.xlu1 %321 }
 0x374   :  { %v193_v13 = vpack.c.bf16 %v192_v12, %v191_v11 }
 0x376   :  { %764 = vmatmul.mubr.msk.bf16.vlgmr.msra.gmra.mrb[0].mxu0 %vm119_vm2, %v193_v13  ;;  %v716_v13 = vld [vmem:[%s1121_s6] ss:$0 sm:$0xff] }
 0x377   :  { %v831_v15 = vpop.eup %830  ;;  %774 = vmatpush3.bf16.msra.mxu0 %v322_v14  ;;  %775 = vmatprep.mubr.msk.bf16.mxu0 %vm847_vm0, %v846_v0 }
 0x378   :  { %785 = vmatprep.subr.bf16.mxu0 %v846_v0  ;;  %v318_v17 = vmul.f32 %v831_v15, %v823_v61 }
 0x379   :  { %v833_v16 = vpop.eup %832 }
 0x37a   :  { %v319_v18 = vmul.f32 %v833_v16, %v825_v63 }
 0x37c   :  { %v320_v19 = vpack.c.bf16 %v319_v18, %v318_v17  ;;  %v717_v18 = vld [vmem:[%s1122_s7] ss:$0 sm:$0xff] }
 0x37e   :  { %776 = vmatmul.mubr.msk.bf16.vlgmr.msra.gmra.mrb[4].mxu0 %vm119_vm2, %v320_v19 }
 0x37f   :  { %787 = vmatprep.mubr.msk.bf16.mxu0 %vm847_vm0, %v846_v0  ;;  %786 = vmatpush3.bf16.msra.mxu0 %v242_v22 }
 0x380   :  { %799 = vmatprep.subr.bf16.mxu0 %v846_v0 }
 0x449   :  { %v234_v26 = vpop.f32.mrb[0].mxu0 }
 0x44a   :  { %v765_v27 = vpop.f32.mrb[1].mxu0 }
 0x44b   :  { %v237_v28 = vpop.f32.mrb[2].mxu0  ;;  %v594_v27 = vld [vmem:[%s1123_s10 + $0x18] sm:$0xff] }
 0x44c   :  { %v241_v29 = vpack.c.bf16 %v237_v28, %v234_v26  ;;  %v766_v30 = vpop.f32.mrb[3].mxu0  ;;  %v599_v26 = vpack.c.bf16 %v592_v24, %v591_v23  ;;  %v600_v28 = vpack.c.bf16 %v594_v27, %v593_v25  ;;  %v722_v25 = vld [vmem:[%s1126_s12] ss:$0 sm:$0xff] }
 0x44d   :  { %v596_v30 = vld [vmem:[%s1123_s10 + $0x28] sm:$0xff] }
 0x44e   :  { %788 = vmatmul.mubr.msk.bf16.vlgmr.msra.gmra.mrb[8].mxu0 %vm119_vm2, %v241_v29  ;;  %v595_v29 = vld [vmem:[%s1123_s10 + $0x20] sm:$0xff] }
 0x44f   :  { %807 = vmatprep.mubr.msk.bf16.mxu0 %vm847_vm0, %v846_v0  ;;  %800 = vmatpush3.bf16.msra.mxu0 %v599_v26 }
 0x450   :  { %801 = vmatprep.subr.bf16.mxu0 %v846_v0 }
 0x451   :  { %v361_v31 = vpop.f32.mrb[4].mxu0 }
 0x452   :  { %v777_v32 = vpop.f32.mrb[5].mxu0 }
 0x453   :  { %v364_v33 = vpop.f32.mrb[6].mxu0  ;;  %802 = vmatpush3.bf16.msra.mxu0 %v600_v28  ;;  %v597_v32 = vld [vmem:[%s1123_s10 + $0x30] sm:$0xff]  ;;  %v723_v28 = vld [vmem:[%s1127_s13] ss:$0 sm:$0xff] }
 0x454   :  { %v368_v34 = vpack.c.bf16 %v364_v33, %v361_v31  ;;  %v778_v35 = vpop.f32.mrb[7].mxu0  ;;  %v601_v31 = vpack.c.bf16 %v596_v30, %v595_v29  ;;  %803 = vmatprep.subr.bf16.mxu0 %v846_v0  ;;  %v598_v33 = vld [vmem:[%s1123_s10 + $0x38] sm:$0xff] }
 0x455   :  { %v718_v35 = vld [vmem:[%s1124_s9] ss:$0 sm:$0xff] }
 0x456   :  { %782 = vmatmul.mubr.msk.bf16.vlgmr.msra.gmra.mrb[12].mxu1 %vm119_vm2, %v368_v34  ;;  %v602_v34 = vpack.c.bf16 %v598_v33, %v597_v32 }
 0x457   :  { %795 = vmatprep.mubr.msk.bf16.mxu1 %vm847_vm0, %v846_v0  ;;  %804 = vmatpush3.bf16.msra.mxu0 %v601_v31 }
 0x458   :  { %805 = vmatprep.subr.bf16.mxu0 %v846_v0 }
 0x45b   :  { %806 = vmatpush3.bf16.msra.mxu0 %v602_v34 }
 0x521   :  { %v451_v36 = vpop.f32.mrb[8].mxu0 }
 0x522   :  { %v789_v37 = vpop.f32.mrb[9].mxu0 }
 0x523   :  { %v454_v38 = vpop.f32.mrb[10].mxu0 }
 0x524   :  { %v790_v39 = vpop.f32.mrb[11].mxu0 }
 0x529   :  { %v407_v40 = vpop.f32.mrb[12].mxu1 }
 0x52a   :  { %v452_v42 = vadd.f32 %v451_v36, %v407_v40  ;;  %v783_v43 = vpop.f32.mrb[13].mxu1 }
 0x52b   :  { %v410_v44 = vpop.f32.mrb[14].mxu1 }
 0x52c   :  { %v465_v45 = vadd.f32 %v715_v41, %v452_v42  ;;  %v455_v46 = vadd.f32 %v454_v38, %v410_v44  ;;  %v784_v47 = vpop.f32.mrb[15].mxu1 }
 0x52e   :  { %v466_v48 = vadd.f32 %v715_v41, %v455_v46  ;;  %v467_v49 = vadd.f32 %v465_v45, %v949_v7 }
 0x530   :  { %v471_v50 = vsel %vm64_vm1, %v467_v49, 0.0  ;;  %v468_v51 = vadd.f32 %v466_v48, %v954_v8  ;;  %v515_v8 = vld [vmem:[%s1120_s8] sm:$0xff] }
 0x531   :  { %472 = vadd.xlane.f32.xlu1 %v471_v50  ;;  %v519_v63 = vpack.c.bf16 %v516_v62, %v515_v8 }
 0x532   :  { %v474_v52 = vsel %vm64_vm1, %v468_v51, 0.0 }
 0x533   :  { %475 = vadd.xlane.f32.xlu0 %v474_v52  ;;  %792 = vmatpush3.bf16.msra.mxu1 %v519_v63 }
 0x534   :  { %793 = vmatprep.subr.bf16.mxu1 %v846_v0 }
 0x537   :  { %794 = vmatpush3.bf16.msra.mxu1 %v520_v3 }
 0x5be   :  { %v473_v53 = vpop.xlane.xlu1 %472 }
 0x5bf   :  { %v478_v54 = vmul.f32 0.03125, %v473_v53 }
 0x5c0   :  { %v476_v55 = vpop.xlane.xlu0 %475 }
 0x5c1   :  { %v480_v56 = vsub.f32 %v467_v49, %v478_v54  ;;  %v479_v57 = vmul.f32 0.03125, %v476_v55 }
 0x5c3   :  { %v481_v58 = vsub.f32 %v468_v51, %v479_v57  ;;  %v482_v59 = vmul.f32 %v480_v56, %v480_v56 }
 0x5c5   :  { %v484_v60 = vsel %vm64_vm1, %v482_v59, 0.0  ;;  %v483_v61 = vmul.f32 %v481_v58, %v481_v58 }
 0x5c6   :  { %485 = vadd.xlane.f32.xlu0 %v484_v60  ;;  %v720_v60 = vld [vmem:[%s1125_s11] ss:$0 sm:$0xff] }
 0x5c7   :  { %v487_v7 = vsel %vm64_vm1, %v483_v61, 0.0 }
 0x5c8   :  { %488 = vadd.xlane.f32.xlu1 %v487_v7 }
 0x653   :  { %v486_v4 = vpop.xlane.xlu0 %485 }
 0x654   :  { %v490_v5 = vmul.f32 0.03125, %v486_v4 }
 0x655   :  { %v489_v6 = vpop.xlane.xlu1 %488 }
 0x656   :  { %v492_v9 = vadd.f32 1e-12, %v490_v5  ;;  %v491_v10 = vmul.f32 0.03125, %v489_v6 }
 0x658   :  { %834 = vrsqrt.f32 %v492_v9  ;;  %v493_v11 = vadd.f32 1e-12, %v491_v10 }
 0x65a   :  { %836 = vrsqrt.f32 %v493_v11 }
 0x662   :  { %v835_v12 = vpop.eup %834 }
 0x663   :  { %v496_v14 = vmul.f32 %v835_v12, %v480_v56 }
 0x664   :  { %v837_v15 = vpop.eup %836 }
 0x665   :  { %v504_v16 = vmul.f32 %v716_v13, %v496_v14  ;;  %v497_v17 = vmul.f32 %v837_v15, %v481_v58 }
 0x667   :  { %v505_v19 = vmul.f32 %v716_v13, %v497_v17  ;;  %v1054_v20 = vadd.f32 %v717_v18, %v504_v16 }
 0x669   :  { %v1056_v21 = vadd.f32 %v717_v18, %v505_v19 }
 0x66b   :  { %v514_v22 = vpack.c.bf16 %v1056_v21, %v1054_v20 }
 0x66d   :  { %796 = vmatmul.mubr.msk.bf16.vlgmr.msra.gmra.mrb[16].mxu1 %vm64_vm1, %v514_v22 }
 0x740   :  { %v565_v36 = vpop.f32.mrb[16].mxu1 }
 0x741   :  { %v566_v37 = vadd.f32 %v718_v35, %v565_v36  ;;  %v797_v38 = vpop.f32.mrb[17].mxu1 }
 0x742   :  { %v568_v39 = vpop.f32.mrb[18].mxu1 }
 0x743   :  { %v574_v40 = vmul.f32 0.044715, %v566_v37  ;;  %v569_v41 = vadd.f32 %v718_v35, %v568_v39  ;;  %v798_v42 = vpop.f32.mrb[19].mxu1  ;;  %v572_v54 = vmul.f32 0.5, %v566_v37 }
 0x745   :  { %v576_v43 = vmul.f32 %v574_v40, %v566_v37  ;;  %v575_v44 = vmul.f32 0.044715, %v569_v41  ;;  %v573_v55 = vmul.f32 0.5, %v569_v41 }
 0x747   :  { %v578_v45 = vmul.f32 %v576_v43, %v566_v37  ;;  %v577_v46 = vmul.f32 %v575_v44, %v569_v41 }
 0x749   :  { %v580_v47 = vadd.f32 %v578_v45, %v566_v37  ;;  %v579_v48 = vmul.f32 %v577_v46, %v569_v41 }
 0x74b   :  { %v582_v49 = vmul.f32 0.7978846, %v580_v47  ;;  %v581_v0 = vadd.f32 %v579_v48, %v569_v41 }
 0x74d   :  { %838 = vtanh.f32 %v582_v49  ;;  %v583_v50 = vmul.f32 0.7978846, %v581_v0 }
 0x74f   :  { %840 = vtanh.f32 %v583_v50 }
 0x757   :  { %v839_v51 = vpop.eup %838 }
 0x758   :  { %v586_v52 = vadd.f32 1.0, %v839_v51 }
 0x759   :  { %v841_v53 = vpop.eup %840 }
 0x75a   :  { %v587_v56 = vadd.f32 1.0, %v841_v53  ;;  %v588_v57 = vmul.f32 %v586_v52, %v572_v54 }
 0x75c   :  { %v589_v58 = vmul.f32 %v587_v56, %v573_v55 }
 0x75e   :  { %v590_v59 = vpack.c.bf16 %v589_v58, %v588_v57 }
 0x760   :  { %808 = vmatmul.mubr.msk.bf16.vlgmr.msra.gmra.mrb[12].mxu0 %vm610_vm3, %v590_v59 }
 0x833   :  { %v648_v61 = vpop.f32.mrb[12].mxu0 }
 0x834   :  { %v649_v7 = vadd.f32 %v720_v60, %v648_v61  ;;  %v809_v8 = vpop.f32.mrb[13].mxu0 }
 0x835   :  { %v651_v62 = vpop.f32.mrb[14].mxu0 }
 0x836   :  { %v652_v63 = vadd.f32 %v720_v60, %v651_v62  ;;  %v810_v1 = vpop.f32.mrb[15].mxu0  ;;  %v655_v2 = vadd.f32 %v649_v7, %v1054_v20 }
 0x838   :  { %v659_v3 = vsel %vm64_vm1, %v655_v2, 0.0  ;;  %v656_v4 = vadd.f32 %v652_v63, %v1056_v21 }
 0x839   :  { %660 = vadd.xlane.f32.xlu0 %v659_v3 }
 0x83a   :  { %v662_v5 = vsel %vm64_vm1, %v656_v4, 0.0 }
 0x83b   :  { %663 = vadd.xlane.f32.xlu1 %v662_v5 }
 0x8c6   :  { %v661_v6 = vpop.xlane.xlu0 %660 }
 0x8c7   :  { %v665_v9 = vmul.f32 0.03125, %v661_v6 }
 0x8c8   :  { %v664_v10 = vpop.xlane.xlu1 %663 }
 0x8c9   :  { %v667_v11 = vsub.f32 %v655_v2, %v665_v9  ;;  %v666_v12 = vmul.f32 0.03125, %v664_v10 }
 0x8cb   :  { %v668_v13 = vsub.f32 %v656_v4, %v666_v12  ;;  %v669_v14 = vmul.f32 %v667_v11, %v667_v11 }
 0x8cd   :  { %v671_v15 = vsel %vm64_vm1, %v669_v14, 0.0  ;;  %v670_v16 = vmul.f32 %v668_v13, %v668_v13 }
 0x8ce   :  { %672 = vadd.xlane.f32.xlu0 %v671_v15 }
 0x8cf   :  { %v674_v17 = vsel %vm64_vm1, %v670_v16, 0.0 }
 0x8d0   :  { %675 = vadd.xlane.f32.xlu1 %v674_v17 }
 0x95b   :  { %v673_v18 = vpop.xlane.xlu0 %672 }
 0x95c   :  { %v677_v19 = vmul.f32 0.03125, %v673_v18 }
 0x95d   :  { %v676_v20 = vpop.xlane.xlu1 %675 }
 0x95e   :  { %v679_v21 = vadd.f32 1e-12, %v677_v19  ;;  %v678_v22 = vmul.f32 0.03125, %v676_v20 }
 0x960   :  { %842 = vrsqrt.f32 %v679_v21  ;;  %v680_v23 = vadd.f32 1e-12, %v678_v22 }
 0x962   :  { %844 = vrsqrt.f32 %v680_v23 }
 0x96a   :  { %v843_v24 = vpop.eup %842 }
 0x96b   :  { %v683_v26 = vmul.f32 %v843_v24, %v667_v11 }
 0x96c   :  { %v845_v27 = vpop.eup %844 }
 0x96d   :  { %v691_v29 = vmul.f32 %v722_v25, %v683_v26  ;;  %v684_v30 = vmul.f32 %v845_v27, %v668_v13 }
 0x96f   :  { %v699_v31 = vadd.f32 %v723_v28, %v691_v29  ;;  %v692_v32 = vmul.f32 %v722_v25, %v684_v30 }
 0x971   :  { %701 = vst.msk [vmem:[%s1128_s14] sm:$0xff] %vm64_vm1, %v699_v31  ;;  %v700_v33 = vadd.f32 %v723_v28, %v692_v32 }
 0x973   :  { %702 = vst.msk [vmem:[%s1128_s14 + $0x8] sm:$0xff] %vm64_vm1, %v700_v33 }

</bundles_post_ra>
